<compile_context>
chip_gen: v5e
topology: v5e:2x2
jax: 0.10.0
libtpu: 0.0.40
codegen_flags: <defaults>
</compile_context>

<pallas_src>
import jax
import jax.numpy as jnp
from jax.experimental import pallas as pl
from jax.experimental.pallas import tpu as pltpu


def _round_up(x, m):
    return ((x + m - 1) // m) * m


def _default_vmem_limit():
    """Generation-aware VMEM budget: ~48 MiB on 64-MiB parts (v7x),
    ~96 MiB on 128-MiB parts (v5e/v6e)."""
    cap = 64 * 1024 * 1024
    try:
        cap = int(pltpu.get_tpu_info().vmem_capacity_bytes)
    except Exception:
        pass
    if cap <= 64 * 1024 * 1024:
        return 48 * 1024 * 1024
    return 96 * 1024 * 1024


def sae_kernel(x_ref, we_ref, be_ref, wd_ref, bd_ref, xhat_ref, r_ref):
    # x_ref:    (TB, E)   batch tile of inputs (compute dtype, e.g. bf16)
    # we_ref:   (E, TH)   encoder weight tile (transposed, compute dtype)
    # be_ref:   (1, TH)   encoder bias tile (f32)
    # wd_ref:   (TH, E)   decoder weight tile (transposed, compute dtype)
    # bd_ref:   (1, E)    decoder bias (f32)
    # xhat_ref: (TB, E)   f32 reconstruction output, resident over the j axis
    # r_ref:    (TB, TH)  hidden representation output tile
    j = pl.program_id(1)

    # Encoder: (TB,E) @ (E,TH) -> (TB,TH), f32 accumulation on the MXU.
    h = jnp.dot(x_ref[...], we_ref[...], preferred_element_type=jnp.float32)
    r = jnp.maximum(h + be_ref[...], 0.0)            # activation = ReLU
    # L1Penalty.forward is identity -> nothing to do in the forward pass.
    r_ref[...] = r.astype(r_ref.dtype)

    # Decoder: accumulate this hidden tile's contribution directly into the
    # resident f32 xhat output block; initialize it with b_dec at j == 0.
    @pl.when(j == 0)
    def _():
        xhat_ref[...] = jnp.broadcast_to(bd_ref[...], xhat_ref.shape)

    xhat_ref[...] += jnp.dot(r.astype(wd_ref.dtype), wd_ref[...],
                             preferred_element_type=jnp.float32)


def prepare_sae_params(w_enc, b_enc, w_dec, b_dec, compute_dtype=jnp.bfloat16):
    """One-time pad + transpose + cast of the weights (hoisted out of the
    per-forward hot path). w_enc: [H, E]; w_dec: [E, H]."""
    H, E = w_enc.shape
    E_pad = _round_up(E, 128)
    H_pad = _round_up(H, 128)
    we_t = jnp.zeros((E_pad, H_pad), compute_dtype).at[:E, :H].set(
        w_enc.T.astype(compute_dtype))
    wd_t = jnp.zeros((H_pad, E_pad), compute_dtype).at[:H, :E].set(
        w_dec.T.astype(compute_dtype))
    be = jnp.zeros((1, H_pad), jnp.float32).at[0, :H].set(
        b_enc.astype(jnp.float32))
    bd = jnp.zeros((1, E_pad), jnp.float32).at[0, :E].set(
        b_dec.astype(jnp.float32))
    return dict(we_t=we_t, wd_t=wd_t, be=be, bd=bd, E=E, H=H,
                E_pad=E_pad, H_pad=H_pad, compute_dtype=compute_dtype)


def sae_forward_prepared(x, params, *, tb=512, th=256, r_dtype=None,
                         weights_resident=None, vmem_limit_bytes=None):
    """x: [B, E]; params: output of prepare_sae_params.
    Returns (x_, r) matching the PyTorch module forward()."""
    B, E = x.shape
    assert E == params["E"], "embedding dim mismatch with prepared params"
    E_pad, H_pad, H = params["E_pad"], params["H_pad"], params["H"]
    compute_dtype = params["compute_dtype"]
    cbytes = jnp.dtype(compute_dtype).itemsize
    out_dtype = x.dtype
    r_dtype = out_dtype if r_dtype is None else r_dtype
    r_bytes = jnp.dtype(r_dtype).itemsize

    if vmem_limit_bytes is None:
        vmem_limit_bytes = _default_vmem_limit()
    budget = vmem_limit_bytes - 6 * 1024 * 1024   # headroom for compiler scratch

    # --- batch tile: multiple of 16 (bf16 packs (16,128) per vreg) ----------
    tb = max(16, _round_up(min(tb, _round_up(B, 16)), 16))
    # Keep >= 2 batch tiles for v7x's two TensorCores, but only when it does
    # not push tb below the compute/BW crossover region.
    half_b = _round_up((B + 1) // 2, 16)
    if half_b >= 256:
        tb = min(tb, half_b)

    def vmem_est(tb_, th_):
        return (2 * tb_ * E_pad * cbytes            # x   (double-buffered)
                + 4 * E_pad * th_ * cbytes          # W_enc + W_dec blocks
                + 2 * tb_ * E_pad * 4               # xhat (f32, resident)
                + 2 * tb_ * th_ * r_bytes           # r
                + 2 * (th_ + E_pad) * 4)            # biases

    # --- hidden tile: weights-resident fast path when everything fits -------
    if weights_resident is None:
        weights_resident = vmem_est(tb, H_pad) <= budget
    if weights_resident:
        th = H_pad
    else:
        th = min(_round_up(max(th, 128), 128), H_pad)
        while H_pad % th != 0:          # th must divide the padded hidden dim
            th -= 128
    while vmem_est(tb, th) > budget and tb > 16:
        tb = max(16, _round_up(tb // 2, 16))

    B_pad = _round_up(B, tb)
    grid = (B_pad // tb, H_pad // th)

    # --- per-call input padding (skipped when already aligned) --------------
    if (B_pad, E_pad) == (B, E) and x.dtype == compute_dtype:
        xp = x
    else:
        xp = jnp.zeros((B_pad, E_pad), compute_dtype).at[:B, :E].set(
            x.astype(compute_dtype))

    # Advisory cost estimate for the XLA scheduler.
    flops = 4 * B_pad * E_pad * H_pad
    weight_fetches = 1 if weights_resident else grid[0]
    bytes_accessed = (
        B_pad * E_pad * cbytes                                   # x
        + weight_fetches * 2 * E_pad * H_pad * cbytes            # W_enc + W_dec
        + (H_pad + E_pad) * 4                                    # biases
        + B_pad * H_pad * r_bytes + B_pad * E_pad * 4            # r + xhat
    )

    xhat_p, r_p = pl.pallas_call(
        sae_kernel,
        out_shape=(
            jax.ShapeDtypeStruct((B_pad, E_pad), jnp.float32),   # xhat (f32 acc)
            jax.ShapeDtypeStruct((B_pad, H_pad), r_dtype),       # r
        ),
        grid_spec=pltpu.PrefetchScalarGridSpec(
            num_scalar_prefetch=0,
            grid=grid,
            in_specs=[
                pl.BlockSpec((tb, E_pad), lambda i, j: (i, 0)),   # x batch tile
                pl.BlockSpec((E_pad, th), lambda i, j: (0, j)),   # W_enc^T cols
                pl.BlockSpec((1, th), lambda i, j: (0, j)),       # b_enc tile
                pl.BlockSpec((th, E_pad), lambda i, j: (j, 0)),   # W_dec^T rows
                pl.BlockSpec((1, E_pad), lambda i, j: (0, 0)),    # b_dec
            ],
            out_specs=[
                pl.BlockSpec((tb, E_pad), lambda i, j: (i, 0)),   # xhat resident over j
                pl.BlockSpec((tb, th), lambda i, j: (i, j)),      # r
            ],
        ),
        compiler_params=pltpu.CompilerParams(
            dimension_semantics=("parallel", "arbitrary"),
            vmem_limit_bytes=vmem_limit_bytes,
        ),
        cost_estimate=pl.CostEstimate(
            flops=flops, transcendentals=0, bytes_accessed=bytes_accessed),
    )(xp, params["we_t"], params["be"], params["wd_t"], params["bd"])

    x_ = xhat_p[:B, :E]
    if out_dtype != jnp.float32:
        x_ = x_.astype(out_dtype)
    return x_, r_p[:B, :H]


def sparse_autoencoder_forward(x, w_enc, b_enc, w_dec, b_dec,
                               compute_dtype=jnp.bfloat16, **kwargs):
    """Convenience wrapper: prepares weights then runs the kernel."""
    params = prepare_sae_params(w_enc, b_enc, w_dec, b_dec, compute_dtype)
    return sae_forward_prepared(x, params, **kwargs)


def _reference(x, w_enc, b_enc, w_dec, b_dec, compute_dtype):
    """Pure-JAX reference mirroring the kernel's mixed precision.
    NOTE: the hidden activations are quantized to bf16 before the decoder —
    an intentional mixed-precision choice; it will not bit-match torch f32."""
    xq = x.astype(compute_dtype).astype(jnp.float32)
    weq = w_enc.astype(compute_dtype).astype(jnp.float32)
    wdq = w_dec.astype(compute_dtype).astype(jnp.float32)
    r = jnp.maximum(xq @ weq.T + b_enc.astype(jnp.float32), 0.0)
    rq = r.astype(compute_dtype).astype(jnp.float32)
    x_ = rq @ wdq.T + b_dec.astype(jnp.float32)
    return x_, r


if __name__ == "__main__":
    key = jax.random.PRNGKey(0)

    def make_inputs(key, B, E, H):
        kx, kwe, kbe, kwd, kbd = jax.random.split(key, 5)
        x = jax.random.normal(kx, (B, E), dtype=jnp.float32)
        w_enc = jax.random.uniform(kwe, (H, E), dtype=jnp.float32,
                                   minval=-1.0 / jnp.sqrt(E), maxval=1.0 / jnp.sqrt(E))
        b_enc = jax.random.uniform(kbe, (H,), dtype=jnp.float32,
                                   minval=-1.0 / jnp.sqrt(E), maxval=1.0 / jnp.sqrt(E))
        w_dec = jax.random.uniform(kwd, (E, H), dtype=jnp.float32,
                                   minval=-1.0 / jnp.sqrt(H), maxval=1.0 / jnp.sqrt(H))
        b_dec = jax.random.uniform(kbd, (E,), dtype=jnp.float32,
                                   minval=-1.0 / jnp.sqrt(H), maxval=1.0 / jnp.sqrt(H))
        return x, w_enc, b_enc, w_dec, b_dec

    k1, k2 = jax.random.split(key)

    # 1) Module-scale shapes: batch=8, emb_d=32, rep_dim=16
    #    (weights-resident fast path; grid collapses to 1x1).
    x1, we1, be1, wd1, bd1 = make_inputs(k1, B=8, E=32, H=16)
    x_1, r1 = sparse_autoencoder_forward(x1, we1, be1, wd1, bd1)
    jax.block_until_ready((x_1, r1))
    xr1, rr1 = _reference(x1, we1, be1, wd1, bd1, jnp.bfloat16)
    assert jnp.allclose(r1, rr1, atol=2e-2, rtol=2e-2)
    assert jnp.allclose(x_1, xr1, atol=2e-2, rtol=2e-2)

    # 2) Larger shapes: exercise the streamed hidden-axis accumulator path
    #    (2 batch tiles x 3 hidden tiles) and prepared-params reuse.
    x2, we2, be2, wd2, bd2 = make_inputs(k2, B=48, E=64, H=320)
    prep = prepare_sae_params(we2, be2, wd2, bd2)
    x_2, r2 = sae_forward_prepared(x2, prep, tb=32, th=128,
                                   weights_resident=False)
    jax.block_until_ready((x_2, r2))
    xr2, rr2 = _reference(x2, we2, be2, wd2, bd2, jnp.bfloat16)
    assert jnp.allclose(r2, rr2, atol=2e-2, rtol=2e-2)
    assert jnp.allclose(x_2, xr2, atol=2e-2, rtol=2e-2)

    # Second call reusing the same prepared params (auto weights-resident path).
    x_2b, r2b = sae_forward_prepared(x2, prep)
    jax.block_until_ready((x_2b, r2b))
    assert jnp.allclose(x_2b, xr2, atol=2e-2, rtol=2e-2)
    assert jnp.allclose(r2b, rr2, atol=2e-2, rtol=2e-2)

    print("KERNEL_OK")
</pallas_src>

<mosaic_0001>
module attributes {stable_mosaic.version = 11 : i64} {
  func.func @sae_kernel(%arg0: i32, %arg1: i32, %arg2: memref<16x128xbf16, #tpu.memory_space<vmem>>, %arg3: memref<128x128xbf16, #tpu.memory_space<vmem>>, %arg4: memref<1x128xf32, #tpu.memory_space<vmem>>, %arg5: memref<128x128xbf16, #tpu.memory_space<vmem>>, %arg6: memref<1x128xf32, #tpu.memory_space<vmem>>, %arg7: memref<16x128xf32, #tpu.memory_space<vmem>>, %arg8: memref<16x128xf32, #tpu.memory_space<vmem>>) attributes {dimension_semantics = [#tpu.dimension_semantics<parallel>, #tpu.dimension_semantics<arbitrary>], iteration_bounds = array<i64: 1, 1>, scalar_prefetch = 0 : i64, scratch_operands = 0 : i64, tpu.core_type = #tpu.core_type<tc>, window_params = [{transform_indices = @transform_0, window_bounds = array<i64: 16, 128>}, {transform_indices = @transform_1, window_bounds = array<i64: 128, 128>}, {transform_indices = @transform_2, window_bounds = array<i64: 1, 128>}, {transform_indices = @transform_3, window_bounds = array<i64: 128, 128>}, {pipeline_mode = #tpu.pipeline_mode<synchronous>, transform_indices = @transform_4, window_bounds = array<i64: 1, 128>}, {transform_indices = @transform_5, window_bounds = array<i64: 16, 128>}, {transform_indices = @transform_6, window_bounds = array<i64: 16, 128>}]} {
    %c0 = arith.constant 0 : index
    %c0_0 = arith.constant 0 : index
    %0 = vector.load %arg2[%c0, %c0_0] : memref<16x128xbf16, #tpu.memory_space<vmem>>, vector<16x128xbf16>
    %c0_1 = arith.constant 0 : index
    %c0_2 = arith.constant 0 : index
    %1 = vector.load %arg3[%c0_1, %c0_2] : memref<128x128xbf16, #tpu.memory_space<vmem>>, vector<128x128xbf16>
    %cst = arith.constant dense<0.000000e+00> : vector<16x128xf32>
    %2 = tpu.matmul %0, %1, %cst {dimension_numbers = #tpu.dot_dimension_numbers<[1], [0], [0], [1], [0, 0, 1, 1], [], []>} : vector<16x128xbf16>, vector<128x128xbf16>, vector<16x128xf32> -> vector<16x128xf32>
    %c0_3 = arith.constant 0 : index
    %c0_4 = arith.constant 0 : index
    %3 = vector.load %arg4[%c0_3, %c0_4] : memref<1x128xf32, #tpu.memory_space<vmem>>, vector<1x128xf32>
    %4 = vector.broadcast %3 : vector<1x128xf32> to vector<16x128xf32>
    %5 = arith.addf %2, %4 : vector<16x128xf32>
    %cst_5 = arith.constant 0.000000e+00 : f32
    %6 = vector.broadcast %cst_5 : f32 to vector<16x128xf32>
    %7 = arith.maximumf %5, %6 : vector<16x128xf32>
    %c0_6 = arith.constant 0 : index
    %c0_7 = arith.constant 0 : index
    %8 = vector.load %arg8[%c0_6, %c0_7] : memref<16x128xf32, #tpu.memory_space<vmem>>, vector<16x128xf32>
    tpu.vector_store %arg8[%c0_6, %c0_7], %7 {strides = array<i32>} : memref<16x128xf32, #tpu.memory_space<vmem>>, vector<16x128xf32>,
    %c0_i32 = arith.constant 0 : i32
    %9 = arith.cmpi eq, %arg1, %c0_i32 : i32
    %10 = arith.extui %9 : i1 to i32
    %c0_i32_8 = arith.constant 0 : i32
    %11 = arith.cmpi ne, %10, %c0_i32_8 : i32
    scf.if %11 {
      %c0_16 = arith.constant 0 : index
      %c0_17 = arith.constant 0 : index
      %18 = vector.load %arg6[%c0_16, %c0_17] : memref<1x128xf32, #tpu.memory_space<vmem>>, vector<1x128xf32>
      %19 = vector.shape_cast %18 : vector<1x128xf32> to vector<1x128xf32>
      %20 = vector.broadcast %19 : vector<1x128xf32> to vector<16x128xf32>
      %c0_18 = arith.constant 0 : index
      %c0_19 = arith.constant 0 : index
      %21 = vector.load %arg7[%c0_18, %c0_19] : memref<16x128xf32, #tpu.memory_space<vmem>>, vector<16x128xf32>
      tpu.vector_store %arg7[%c0_18, %c0_19], %20 {strides = array<i32>} : memref<16x128xf32, #tpu.memory_space<vmem>>, vector<16x128xf32>,
    } else {
    }
    %c0_9 = arith.constant 0 : index
    %c0_10 = arith.constant 0 : index
    %12 = vector.load %arg7[%c0_9, %c0_10] : memref<16x128xf32, #tpu.memory_space<vmem>>, vector<16x128xf32>
    %13 = arith.truncf %7 : vector<16x128xf32> to vector<16x128xbf16>
    %c0_11 = arith.constant 0 : index
    %c0_12 = arith.constant 0 : index
    %14 = vector.load %arg5[%c0_11, %c0_12] : memref<128x128xbf16, #tpu.memory_space<vmem>>, vector<128x128xbf16>
    %cst_13 = arith.constant dense<0.000000e+00> : vector<16x128xf32>
    %15 = tpu.matmul %13, %14, %cst_13 {dimension_numbers = #tpu.dot_dimension_numbers<[1], [0], [0], [1], [0, 0, 1, 1], [], []>} : vector<16x128xbf16>, vector<128x128xbf16>, vector<16x128xf32> -> vector<16x128xf32>
    %16 = arith.addf %12, %15 : vector<16x128xf32>
    %c0_14 = arith.constant 0 : index
    %c0_15 = arith.constant 0 : index
    %17 = vector.load %arg7[%c0_14, %c0_15] : memref<16x128xf32, #tpu.memory_space<vmem>>, vector<16x128xf32>
    tpu.vector_store %arg7[%c0_14, %c0_15], %16 {strides = array<i32>} : memref<16x128xf32, #tpu.memory_space<vmem>>, vector<16x128xf32>,
    return
  }
  func.func @transform_0(%arg0: i32, %arg1: i32) -> (i32, i32) {
    %c0_i32 = arith.constant 0 : i32
    %c0_i32_0 = arith.constant 0 : i32
    return %arg0, %c0_i32 : i32, i32
  }
  func.func @transform_1(%arg0: i32, %arg1: i32) -> (i32, i32) {
    %c0_i32 = arith.constant 0 : i32
    %c0_i32_0 = arith.constant 0 : i32
    return %c0_i32, %arg1 : i32, i32
  }
  func.func @transform_2(%arg0: i32, %arg1: i32) -> (i32, i32) {
    %c0_i32 = arith.constant 0 : i32
    %c0_i32_0 = arith.constant 0 : i32
    return %c0_i32, %arg1 : i32, i32
  }
  func.func @transform_3(%arg0: i32, %arg1: i32) -> (i32, i32) {
    %c0_i32 = arith.constant 0 : i32
    %c0_i32_0 = arith.constant 0 : i32
    return %arg1, %c0_i32 : i32, i32
  }
  func.func @transform_4(%arg0: i32, %arg1: i32) -> (i32, i32) {
    %c0_i32 = arith.constant 0 : i32
    %c0_i32_0 = arith.constant 0 : i32
    %c0_i32_1 = arith.constant 0 : i32
    return %c0_i32, %c0_i32_0 : i32, i32
  }
  func.func @transform_5(%arg0: i32, %arg1: i32) -> (i32, i32) {
    %c0_i32 = arith.constant 0 : i32
    %c0_i32_0 = arith.constant 0 : i32
    return %arg0, %c0_i32 : i32, i32
  }
  func.func @transform_6(%arg0: i32, %arg1: i32) -> (i32, i32) {
    %c0_i32 = arith.constant 0 : i32
    return %arg0, %arg1 : i32, i32
  }
}

</mosaic_0001>

<bundles_post_ra>
// kernel: tpu_custom_call.1
= control target key start
LH: loop header
LB: loop body
LE: loop exit
PB: predicated region body
PF: predicated region fallthrough
CT: control target
= control target key end

     0   :  { %12 = vsyncpa [#allocation3], 0  ;;  %s587_s0 = inlined_call_operand.hbm [shape: bf16[16,128], index: 0, kind: input, shape index: {}]   ;;  %s588_s1 = inlined_call_operand.hbm [shape: bf16[128,128], index: 1, kind: input, shape index: {}]   ;;  %s589_s2 = inlined_call_operand.vmem [shape: f32[1,128], index: 2, kind: input, shape index: {}]   ;;  %s590_s3 = inlined_call_operand.hbm [shape: bf16[128,128], index: 3, kind: input, shape index: {}]   ;;  %s591_s4 = inlined_call_operand.vmem [shape: f32[1,128], index: 4, kind: input, shape index: {}]   ;;  %s592_s5 = inlined_call_operand.hbm [shape: f32[16,128], index: 5, kind: output, shape index: {0}]   ;;  %s593_s6 = inlined_call_operand.hbm [shape: f32[16,128], index: 6, kind: output, shape index: {1}]  }
   0x1   :  { %13 = vsyncpa [#allocation6], 0 }
   0x2   :  { %14 = vsyncpa [#allocation4], 0 }
   0x3   :  { %15 = vsyncpa [#allocation10], 0  ;;  %s33_s23 = sshll.u32 %s588_s1, 4  ;;  %s522_s24 = smov [#allocation5]   ;;  %s34_s23 = int_to_ptr.hbm [resolvable:$true] %s33_s23 }
   0x4   :  { %s35_s25 = sshll.u32 %s522_s24, 4  ;;  %s20_s28 = sshll.u32 %s587_s0, 4  ;;  %s36_s25 = int_to_ptr.vmem [resolvable:$true] %s35_s25  ;;  %s21_s28 = int_to_ptr.hbm [resolvable:$true] %s20_s28 }
   0x5   :  { %s523_s29 = smov 64   ;;  %s524_s30 = smov 4  }
   0x6   :  { %41 = dma.hbm_to_vmem [thread:$0]  %s34_s23, 1024, %s36_s25, [#allocation6], %s523_s29, %s523_s29, %s524_s30  }
   0x7   :  { %s525_s7 = smov [#allocation2]   ;;  %s48_s11 = sshll.u32 %s590_s3, 4  ;;  %s49_s11 = int_to_ptr.hbm [resolvable:$true] %s48_s11 }
   0x8   :  { %s22_s8 = sshll.u32 %s525_s7, 4  ;;  %s526_s1 = smov [#allocation7]   ;;  %s23_s8 = int_to_ptr.vmem [resolvable:$true] %s22_s8 }
   0x9   :  { %28 = dma.hbm_to_vmem [thread:$0]  %s21_s28, 128, %s23_s8, [#allocation3], %s523_s29, %s523_s29, %s524_s30  }
   0xa   :  { %s50_s12 = sshll.u32 %s526_s1, 4  ;;  %s51_s12 = int_to_ptr.vmem [resolvable:$true] %s50_s12 }
   0xb   :  { %56 = dma.hbm_to_vmem [thread:$0]  %s49_s11, 1024, %s51_s12, [#allocation6], %s523_s29, %s523_s29, %s524_s30  }
   0xc   :  { %514 = dma.done.wait [#allocation3], 128  }
   0xd   :  { %515 = vsyncadd [#allocation3], 4294967168 }
   0xe   :  { %516 = dma.done.wait [#allocation6], 2048  }
   0xf   :  { %517 = vsyncadd [#allocation6], 4294965248  ;;  %v374_v0 = vld [vmem:[#allocation5 + $0x38] sm:$0xff]  ;;  %v373_v1 = vld [vmem:[#allocation5 + $0x30] sm:$0xff]  ;;  %s527_s13 = smov [#allocation9]   ;;  %s279_s17 = sshll.u32 %s593_s6, 4  ;;  %s280_s17 = int_to_ptr.hbm [resolvable:$true] %s279_s17 }
  0x10   :  { %147 = vmatpush.bf16.msra.mxu0 %v374_v0  ;;  %v382_v2 = vld [vmem:[#allocation7 + $0x38] sm:$0xff]  ;;  %v381_v3 = vld [vmem:[#allocation7 + $0x30] sm:$0xff]  ;;  %v372_v4 = vld [vmem:[#allocation5 + $0x28] sm:$0xff]  ;;  %s277_s14 = sshll.u32 %s527_s13, 4  ;;  %s528_s18 = smov 128   ;;  %s278_s14 = int_to_ptr.vmem [resolvable:$true] %s277_s14 }
  0x11   :  { %242 = vmatpush.bf16.msra.mxu1 %v382_v2  ;;  %v380_v5 = vld [vmem:[#allocation7 + $0x28] sm:$0xff]  ;;  %v371_v6 = vld [vmem:[#allocation5 + $0x20] sm:$0xff]  ;;  %v370_v8 = vld [vmem:[#allocation5 + $0x18] sm:$0xff]  ;;  %s530_s21 = smov [#allocation8]   ;;  %s266_s25 = sshll.u32 %s592_s5, 4  ;;  %s267_s25 = int_to_ptr.hbm [resolvable:$true] %s266_s25 }
  0x12   :  { %v379_v7 = vld [vmem:[#allocation7 + $0x20] sm:$0xff]  ;;  %v369_v9 = vld [vmem:[#allocation5 + $0x10] sm:$0xff]  ;;  %v368_v10 = vld [vmem:[#allocation5 + $0x8] sm:$0xff]  ;;  %s264_s22 = sshll.u32 %s530_s21, 4  ;;  %s265_s22 = int_to_ptr.vmem [resolvable:$true] %s264_s22 }
  0x13   :  { %v367_v11 = vld [vmem:[#allocation5] sm:$0xff]  ;;  %v366_v12 = vld [vmem:[#allocation2] sm:$0xff]  ;;  %v377_v14 = vld [vmem:[#allocation7 + $0x10] sm:$0xff] }
  0x14   :  { %148 = vmatpush.bf16.msra.mxu0 %v373_v1  ;;  %v378_v13 = vld [vmem:[#allocation7 + $0x18] sm:$0xff]  ;;  %v376_v15 = vld [vmem:[#allocation7 + $0x8] sm:$0xff]  ;;  %v375_v16 = vld [vmem:[#allocation7] sm:$0xff] }
  0x15   :  { %243 = vmatpush.bf16.msra.mxu1 %v381_v3  ;;  %v392_v17 = vld [vmem:[%s589_s2] ss:$0 sm:$0xff]  ;;  %s529_s2 = smov 8  }
  0x16   :  { %v393_v25 = vld [vmem:[%s591_s4] ss:$0 sm:$0xff] }
  0x18   :  { %149 = vmatpush.bf16.msra.mxu0 %v372_v4 }
  0x19   :  { %244 = vmatpush.bf16.msra.mxu1 %v380_v5 }
  0x1c   :  { %150 = vmatpush.bf16.msra.mxu0 %v371_v6 }
  0x1d   :  { %245 = vmatpush.bf16.msra.mxu1 %v379_v7 }
  0x20   :  { %151 = vmatpush.bf16.msra.mxu0 %v370_v8 }
  0x21   :  { %246 = vmatpush.bf16.msra.mxu1 %v378_v13 }
  0x24   :  { %152 = vmatpush.bf16.msra.mxu0 %v369_v9 }
  0x25   :  { %247 = vmatpush.bf16.msra.mxu1 %v377_v14 }
  0x28   :  { %153 = vmatpush.bf16.msra.mxu0 %v368_v10 }
  0x29   :  { %248 = vmatpush.bf16.msra.mxu1 %v376_v15 }
  0x2c   :  { %154 = vmatpush.bf16.msra.mxu0 %v367_v11 }
  0x2d   :  { %249 = vmatpush.bf16.msra.mxu1 %v375_v16 }
  0x2f   :  { %155 = vmatmul.bf16.vlgmr.msra.gmra.mxu0 %v366_v12 }
  0xac   :  { %v156_v18 = vpop.f32.mrf.mxu0 }
  0xad   :  { %v157_v19 = vadd.f32 %v392_v17, %v156_v18 }
  0xaf   :  { %v161_v20 = vmax.f32 %v157_v19, 0.0 }
  0xb1   :  { %163 = vst [vmem:[#allocation9] sm:$0xff] %v161_v20 }
  0xb4   :  { %v158_v21 = vpop.f32.mrf.mxu0 }
  0xb5   :  { %v159_v22 = vadd.f32 %v392_v17, %v158_v21 }
  0xb7   :  { %v162_v23 = vmax.f32 %v159_v22, 0.0 }
  0xb9   :  { %164 = vst [vmem:[#allocation9 + $0x8] sm:$0xff] %v162_v23  ;;  %v177_v24 = vpack.c.bf16 %v162_v23, %v161_v20 }
  0xba   :  { %285 = dma.vmem_to_hbm [thread:$0]  %s278_s14, 256, %s280_s17, [#allocation10], %s528_s18, %s528_s18, %s529_s2  }
  0xbb   :  { %250 = vmatmul.bf16.vlgmr.msra.gmra.mxu1 %v177_v24 }
 0x138   :  { %v251_v26 = vpop.f32.mrf.mxu1 }
 0x139   :  { %v256_v27 = vadd.f32 %v393_v25, %v251_v26 }
 0x13b   :  { %258 = vst [vmem:[#allocation8] sm:$0xff] %v256_v27 }
 0x140   :  { %v253_v28 = vpop.f32.mrf.mxu1 }
 0x141   :  { %v257_v29 = vadd.f32 %v393_v25, %v253_v28 }
 0x143   :  { %259 = vst [vmem:[#allocation8 + $0x8] sm:$0xff] %v257_v29 }
 0x144   :  { %272 = dma.vmem_to_hbm [thread:$0]  %s265_s22, 256, %s267_s25, [#allocation4], %s528_s18, %s528_s18, %s529_s2  }
 0x145   :  { %518 = dma.done.wait [#allocation4], 256  }
 0x146   :  { %519 = vsyncadd [#allocation4], 4294967040 }
 0x147   :  { %520 = dma.done.wait [#allocation10], 256  }
 0x148   :  { %521 = vsyncadd [#allocation10], 4294967040 }
 0x149   :  { %294 = vsyncpa [#allocation3], 1 }
 0x14a   :  { %295 = vsyncpa [#allocation6], 1 }
 0x14b   :  { %296 = vsyncpa [#allocation4], 1 }
 0x14c   :  { %297 = vsyncpa [#allocation10], 1 }

</bundles_post_ra>
